<compile_context>
chip_gen: v5e
topology: v5e:2x2
jax: 0.10.0
libtpu: 0.0.40
codegen_flags: <defaults>
</compile_context>

<pallas_src>
import functools

import jax
import jax.numpy as jnp
import numpy as np
from jax.experimental import pallas as pl
from jax.experimental.pallas import tpu as pltpu


# ------------------------------ helpers ------------------------------------

def _round_up(x, m):
    return ((x + m - 1) // m) * m


def _apply_activation(y, act):
    """Activation epilogue, always computed in f32."""
    if act in (None, 'linear'):
        return y
    if act == 'relu':
        return jnp.maximum(y, 0.0)
    if act == 'sigmoid':
        return jax.nn.sigmoid(y)
    if act == 'tanh':
        return jnp.tanh(y)
    if act == 'softplus':
        return jax.nn.softplus(y)
    if act == 'leakyrelu':
        return jnp.where(y >= 0.0, y, 0.2 * y)   # module uses slope 0.2
    if act == 'elu':
        return jnp.where(y >= 0.0, y, jnp.expm1(y))
    if act == 'selu':
        alpha = 1.6732632423543772
        scale = 1.0507009873554805
        return scale * jnp.where(y >= 0.0, y, alpha * jnp.expm1(y))
    if act == 'softmax':                         # nn.Softmax(dim=1)
        m = jnp.max(y, axis=-1, keepdims=True)
        e = jnp.exp(y - m)
        return e * pl.reciprocal(jnp.sum(e, axis=-1, keepdims=True), approx=True)
    raise ValueError(f'Unexpected activation: {act}')


# --------------------------- fused Pallas kernel ----------------------------

def _fused_mlp_kernel(*refs, acts, compute_dtype):
    # refs = (x, w0, b0, w1, b1, ..., w_{L-1}, b_{L-1}, o)
    n_layers = len(acts)
    x_ref = refs[0]
    o_ref = refs[1 + 2 * n_layers]

    h = x_ref[...]                                   # (TB, in_dim), compute dtype
    y = None
    for li in range(n_layers):
        w = refs[1 + 2 * li][...]                    # (d_in, d_out), compute dtype
        b = refs[2 + 2 * li][...]                    # (1, d_out), f32
        y = jnp.dot(h, w, preferred_element_type=jnp.float32)
        y = y + b.astype(jnp.float32)
        y = _apply_activation(y, acts[li])           # f32 epilogue
        if li + 1 < n_layers:
            h = y.astype(compute_dtype)              # stays in VMEM/vregs
    o_ref[...] = y.astype(o_ref.dtype)


def fused_mlp(x, params, acts, *, compute_dtype=jnp.bfloat16,
              max_block_batch=512, vmem_budget_bytes=24 << 20):
    """Run the whole MLP act_L(...act_0(x @ W0 + b0)...) in one pallas_call."""
    assert x.ndim == 2
    B, in_dim = x.shape
    n_layers = len(params)
    assert len(acts) == n_layers
    out_dtype = x.dtype
    out_dim = params[-1][0].shape[1]

    # Lane-dense final store: pad the last layer's output columns to 128.
    # Softmax couples columns, so skip padding in that case.
    pad_out = acts[-1] != 'softmax'
    out_dim_p = _round_up(out_dim, 128) if pad_out else out_dim

    cd_bytes = jnp.dtype(compute_dtype).itemsize
    layer_dims = [(w.shape[0], w.shape[1]) for (w, _) in params]
    layer_dims[-1] = (layer_dims[-1][0], out_dim_p)

    def vmem_need(tb):
        need = 2 * tb * in_dim * cd_bytes                 # double-buffered x tile
        need += 2 * tb * out_dim_p * 4                    # double-buffered out tile
        for wi, wo in layer_dims:                         # resident weights/biases
            need += 2 * (wi * wo * cd_bytes + wo * 4)
        max_w = max(wo for _, wo in layer_dims)
        need += tb * max_w * (4 + cd_bytes)               # live intermediates
        return need

    # Batch tile: multiple of 8 sublanes, shrunk until it fits the VMEM budget
    # (budget chosen to be safe for v7x's smaller 64 MiB VMEM).
    tb = _round_up(min(max_block_batch, _round_up(B, 8)), 8)
    while tb > 8 and vmem_need(tb) > vmem_budget_bytes:
        tb = _round_up(tb // 2, 8)

    b_pad = _round_up(B, tb)
    if b_pad != B:
        x = jnp.pad(x, ((0, b_pad - B), (0, 0)))
    x = x.astype(compute_dtype)

    flat_inputs = [x]
    in_specs = [pl.BlockSpec((tb, in_dim), lambda i: (i, 0))]
    flops = 0
    transcendentals = 0
    bytes_accessed = x.size * cd_bytes
    for li, (w, b) in enumerate(params):
        if li == n_layers - 1 and out_dim_p != out_dim:
            w = jnp.pad(w, ((0, 0), (0, out_dim_p - out_dim)))
            b = jnp.pad(b, ((0, 0), (0, out_dim_p - out_dim)))
        wi, wo = w.shape
        flat_inputs.append(w.astype(compute_dtype))
        flat_inputs.append(b.astype(jnp.float32))
        in_specs.append(pl.BlockSpec((wi, wo), lambda i: (0, 0)))  # resident
        in_specs.append(pl.BlockSpec((1, wo), lambda i: (0, 0)))   # resident
        flops += 2 * b_pad * wi * wo
        if acts[li] in ('sigmoid', 'tanh', 'softplus', 'elu', 'selu', 'softmax'):
            transcendentals += b_pad * wo
        bytes_accessed += wi * wo * cd_bytes + wo * 4
    bytes_accessed += b_pad * out_dim_p * jnp.dtype(out_dtype).itemsize

    grid = (pl.cdiv(b_pad, tb),)
    kernel = functools.partial(_fused_mlp_kernel, acts=tuple(acts),
                               compute_dtype=compute_dtype)
    vmem_limit = int(min(max(2 * vmem_need(tb) + (4 << 20), 16 << 20), 56 << 20))

    out = pl.pallas_call(
        kernel,
        out_shape=jax.ShapeDtypeStruct((b_pad, out_dim_p), out_dtype),
        grid=grid,
        in_specs=in_specs,
        out_specs=pl.BlockSpec((tb, out_dim_p), lambda i: (i, 0)),
        compiler_params=pltpu.CompilerParams(
            dimension_semantics=("parallel",),
            vmem_limit_bytes=vmem_limit),
        cost_estimate=pl.CostEstimate(flops=flops,
                                      transcendentals=transcendentals,
                                      bytes_accessed=bytes_accessed),
    )(*flat_inputs)

    return out[:B, :out_dim]


# ----------------------------- FC_image model ------------------------------

def init_fc_image_params(key, in_chan, l_hidden, out_chan, dtype=jnp.float32):
    """Deterministic init. Weights stored as (in_dim, out_dim)."""
    dims = [in_chan] + list(l_hidden) + [out_chan]
    params = []
    for i in range(len(dims) - 1):
        key, kw, kb = jax.random.split(key, 3)
        bound = 1.0 / np.sqrt(dims[i])
        w = jax.random.uniform(kw, (dims[i], dims[i + 1]), dtype,
                               minval=-bound, maxval=bound)
        b = jax.random.uniform(kb, (1, dims[i + 1]), dtype,
                               minval=-bound, maxval=bound)
        params.append((w, b))
    return params


def fc_image_forward(x, params, activations, *, in_chan, out_chan, out_chan_num,
                     compute_dtype=jnp.bfloat16):
    """Mirrors FC_image.forward exactly."""
    if x.ndim == 4:
        h = x.reshape(-1, in_chan)                  # torch .view(-1, in_chan)
        return fused_mlp(h, params, activations, compute_dtype=compute_dtype)
    out = fused_mlp(x, params, activations, compute_dtype=compute_dtype)
    dim = int(np.sqrt(out_chan / out_chan_num))
    return out.reshape(-1, out_chan_num, dim, dim)


# ----------------------------- JAX reference --------------------------------

def _ref_act(y, act):
    if act in (None, 'linear'):
        return y
    if act == 'relu':
        return jnp.maximum(y, 0.0)
    if act == 'sigmoid':
        return jax.nn.sigmoid(y)
    if act == 'tanh':
        return jnp.tanh(y)
    if act == 'softplus':
        return jax.nn.softplus(y)
    if act == 'leakyrelu':
        return jnp.where(y >= 0.0, y, 0.2 * y)
    if act == 'elu':
        return jnp.where(y >= 0.0, y, jnp.expm1(y))
    if act == 'selu':
        alpha, scale = 1.6732632423543772, 1.0507009873554805
        return scale * jnp.where(y >= 0.0, y, alpha * jnp.expm1(y))
    if act == 'softmax':
        return jax.nn.softmax(y, axis=-1)
    raise ValueError(act)


def jax_reference(x2d, params, acts):
    h = x2d
    for (w, b), a in zip(params, acts):
        h = _ref_act(h @ w + b, a)
    return h


# --------------------------------- main ------------------------------------

if __name__ == "__main__":
    # --- Config 1: 4-D image input (the main FC_image path) ----------------
    N, C, H, W = 2, 4, 8, 8
    in_chan = C * H * W                       # 256
    l_hidden = [32, 32]
    activation = ['relu', 'relu']
    out_activation = 'linear'
    out_chan = 2
    out_chan_num = 1
    acts = activation + [out_activation]

    key = jax.random.PRNGKey(0)
    key, kx = jax.random.split(key)
    x = jax.random.normal(kx, (N, C, H, W), jnp.float32)
    params = init_fc_image_params(key, in_chan, l_hidden, out_chan)

    ref = jax_reference(x.reshape(-1, in_chan), params, acts)

    # f32 compute path: strict check against the pure-JAX reference.
    out_f32 = jax.block_until_ready(
        fc_image_forward(x, params, acts, in_chan=in_chan, out_chan=out_chan,
                         out_chan_num=out_chan_num, compute_dtype=jnp.float32))
    np.testing.assert_allclose(np.asarray(out_f32), np.asarray(ref),
                               rtol=1e-5, atol=1e-5)
    assert out_f32.shape == (N, out_chan)

    # bf16 matmul path (v6e/v7x fast path, f32 accumulation): loose check.
    out_bf16 = jax.block_until_ready(
        fc_image_forward(x, params, acts, in_chan=in_chan, out_chan=out_chan,
                         out_chan_num=out_chan_num, compute_dtype=jnp.bfloat16))
    np.testing.assert_allclose(np.asarray(out_bf16), np.asarray(ref),
                               rtol=5e-2, atol=5e-2)

    # --- Config 2: 2-D input path + softmax out_activation ------------------
    in_chan2, out_chan2, out_chan_num2 = 64, 16, 1
    l_hidden2 = [32]
    acts2 = ['tanh', 'softmax']
    key, kx2 = jax.random.split(key)
    x2 = jax.random.normal(kx2, (4, in_chan2), jnp.float32)
    params2 = init_fc_image_params(key, in_chan2, l_hidden2, out_chan2)

    out2 = jax.block_until_ready(
        fc_image_forward(x2, params2, acts2, in_chan=in_chan2,
                         out_chan=out_chan2, out_chan_num=out_chan_num2,
                         compute_dtype=jnp.float32))
    ref2 = jax_reference(x2, params2, acts2)
    dim2 = int(np.sqrt(out_chan2 / out_chan_num2))
    np.testing.assert_allclose(
        np.asarray(out2),
        np.asarray(ref2).reshape(-1, out_chan_num2, dim2, dim2),
        rtol=1e-2, atol=1e-2)   # approx=True EUP reciprocal in softmax
    assert out2.shape == (4, out_chan_num2, dim2, dim2)

    print("KERNEL_OK")
</pallas_src>

<mosaic_0001>
module attributes {stable_mosaic.version = 11 : i64} {
  func.func @_fused_mlp_kernel(%arg0: i32, %arg1: memref<8x256xf32, #tpu.memory_space<vmem>>, %arg2: memref<256x32xf32, #tpu.memory_space<vmem>>, %arg3: memref<1x32xf32, #tpu.memory_space<vmem>>, %arg4: memref<32x32xf32, #tpu.memory_space<vmem>>, %arg5: memref<1x32xf32, #tpu.memory_space<vmem>>, %arg6: memref<32x128xf32, #tpu.memory_space<vmem>>, %arg7: memref<1x128xf32, #tpu.memory_space<vmem>>, %arg8: memref<8x128xf32, #tpu.memory_space<vmem>>) attributes {dimension_semantics = [#tpu.dimension_semantics<parallel>], iteration_bounds = array<i64: 1>, scalar_prefetch = 0 : i64, scratch_operands = 0 : i64, tpu.core_type = #tpu.core_type<tc>, window_params = [{transform_indices = @transform_0, window_bounds = array<i64: 8, 256>}, {pipeline_mode = #tpu.pipeline_mode<synchronous>, transform_indices = @transform_1, window_bounds = array<i64: 256, 32>}, {pipeline_mode = #tpu.pipeline_mode<synchronous>, transform_indices = @transform_2, window_bounds = array<i64: 1, 32>}, {pipeline_mode = #tpu.pipeline_mode<synchronous>, transform_indices = @transform_3, window_bounds = array<i64: 32, 32>}, {pipeline_mode = #tpu.pipeline_mode<synchronous>, transform_indices = @transform_4, window_bounds = array<i64: 1, 32>}, {pipeline_mode = #tpu.pipeline_mode<synchronous>, transform_indices = @transform_5, window_bounds = array<i64: 32, 128>}, {pipeline_mode = #tpu.pipeline_mode<synchronous>, transform_indices = @transform_6, window_bounds = array<i64: 1, 128>}, {transform_indices = @transform_7, window_bounds = array<i64: 8, 128>}]} {
    %c0 = arith.constant 0 : index
    %c0_0 = arith.constant 0 : index
    %0 = vector.load %arg1[%c0, %c0_0] : memref<8x256xf32, #tpu.memory_space<vmem>>, vector<8x256xf32>
    %c0_1 = arith.constant 0 : index
    %c0_2 = arith.constant 0 : index
    %1 = vector.load %arg2[%c0_1, %c0_2] : memref<256x32xf32, #tpu.memory_space<vmem>>, vector<256x32xf32>
    %c0_3 = arith.constant 0 : index
    %c0_4 = arith.constant 0 : index
    %2 = vector.load %arg3[%c0_3, %c0_4] : memref<1x32xf32, #tpu.memory_space<vmem>>, vector<1x32xf32>
    %cst = arith.constant dense<0.000000e+00> : vector<8x32xf32>
    %3 = tpu.matmul %0, %1, %cst {dimension_numbers = #tpu.dot_dimension_numbers<[1], [0], [0], [1], [0, 0, 1, 1], [], []>} : vector<8x256xf32>, vector<256x32xf32>, vector<8x32xf32> -> vector<8x32xf32>
    %4 = vector.broadcast %2 : vector<1x32xf32> to vector<8x32xf32>
    %5 = arith.addf %3, %4 : vector<8x32xf32>
    %cst_5 = arith.constant 0.000000e+00 : f32
    %6 = vector.broadcast %cst_5 : f32 to vector<8x32xf32>
    %7 = arith.maximumf %5, %6 : vector<8x32xf32>
    %c0_6 = arith.constant 0 : index
    %c0_7 = arith.constant 0 : index
    %8 = vector.load %arg4[%c0_6, %c0_7] : memref<32x32xf32, #tpu.memory_space<vmem>>, vector<32x32xf32>
    %c0_8 = arith.constant 0 : index
    %c0_9 = arith.constant 0 : index
    %9 = vector.load %arg5[%c0_8, %c0_9] : memref<1x32xf32, #tpu.memory_space<vmem>>, vector<1x32xf32>
    %cst_10 = arith.constant dense<0.000000e+00> : vector<8x32xf32>
    %10 = tpu.matmul %7, %8, %cst_10 {dimension_numbers = #tpu.dot_dimension_numbers<[1], [0], [0], [1], [0, 0, 1, 1], [], []>} : vector<8x32xf32>, vector<32x32xf32>, vector<8x32xf32> -> vector<8x32xf32>
    %11 = vector.broadcast %9 : vector<1x32xf32> to vector<8x32xf32>
    %12 = arith.addf %10, %11 : vector<8x32xf32>
    %cst_11 = arith.constant 0.000000e+00 : f32
    %13 = vector.broadcast %cst_11 : f32 to vector<8x32xf32>
    %14 = arith.maximumf %12, %13 : vector<8x32xf32>
    %c0_12 = arith.constant 0 : index
    %c0_13 = arith.constant 0 : index
    %15 = vector.load %arg6[%c0_12, %c0_13] : memref<32x128xf32, #tpu.memory_space<vmem>>, vector<32x128xf32>
    %c0_14 = arith.constant 0 : index
    %c0_15 = arith.constant 0 : index
    %16 = vector.load %arg7[%c0_14, %c0_15] : memref<1x128xf32, #tpu.memory_space<vmem>>, vector<1x128xf32>
    %cst_16 = arith.constant dense<0.000000e+00> : vector<8x128xf32>
    %17 = tpu.matmul %14, %15, %cst_16 {dimension_numbers = #tpu.dot_dimension_numbers<[1], [0], [0], [1], [0, 0, 1, 1], [], []>} : vector<8x32xf32>, vector<32x128xf32>, vector<8x128xf32> -> vector<8x128xf32>
    %18 = vector.broadcast %16 : vector<1x128xf32> to vector<8x128xf32>
    %19 = arith.addf %17, %18 : vector<8x128xf32>
    %c0_17 = arith.constant 0 : index
    %c0_18 = arith.constant 0 : index
    %20 = vector.load %arg8[%c0_17, %c0_18] : memref<8x128xf32, #tpu.memory_space<vmem>>, vector<8x128xf32>
    tpu.vector_store %arg8[%c0_17, %c0_18], %19 {strides = array<i32>} : memref<8x128xf32, #tpu.memory_space<vmem>>, vector<8x128xf32>,
    return
  }
  func.func @transform_0(%arg0: i32) -> (i32, i32) {
    %c0_i32 = arith.constant 0 : i32
    %c0_i32_0 = arith.constant 0 : i32
    return %arg0, %c0_i32 : i32, i32
  }
  func.func @transform_1(%arg0: i32) -> (i32, i32) {
    %c0_i32 = arith.constant 0 : i32
    %c0_i32_0 = arith.constant 0 : i32
    %c0_i32_1 = arith.constant 0 : i32
    return %c0_i32, %c0_i32_0 : i32, i32
  }
  func.func @transform_2(%arg0: i32) -> (i32, i32) {
    %c0_i32 = arith.constant 0 : i32
    %c0_i32_0 = arith.constant 0 : i32
    %c0_i32_1 = arith.constant 0 : i32
    return %c0_i32, %c0_i32_0 : i32, i32
  }
  func.func @transform_3(%arg0: i32) -> (i32, i32) {
    %c0_i32 = arith.constant 0 : i32
    %c0_i32_0 = arith.constant 0 : i32
    %c0_i32_1 = arith.constant 0 : i32
    return %c0_i32, %c0_i32_0 : i32, i32
  }
  func.func @transform_4(%arg0: i32) -> (i32, i32) {
    %c0_i32 = arith.constant 0 : i32
    %c0_i32_0 = arith.constant 0 : i32
    %c0_i32_1 = arith.constant 0 : i32
    return %c0_i32, %c0_i32_0 : i32, i32
  }
  func.func @transform_5(%arg0: i32) -> (i32, i32) {
    %c0_i32 = arith.constant 0 : i32
    %c0_i32_0 = arith.constant 0 : i32
    %c0_i32_1 = arith.constant 0 : i32
    return %c0_i32, %c0_i32_0 : i32, i32
  }
  func.func @transform_6(%arg0: i32) -> (i32, i32) {
    %c0_i32 = arith.constant 0 : i32
    %c0_i32_0 = arith.constant 0 : i32
    %c0_i32_1 = arith.constant 0 : i32
    return %c0_i32, %c0_i32_0 : i32, i32
  }
  func.func @transform_7(%arg0: i32) -> (i32, i32) {
    %c0_i32 = arith.constant 0 : i32
    %c0_i32_0 = arith.constant 0 : i32
    return %arg0, %c0_i32 : i32, i32
  }
}

</mosaic_0001>

<bundles_post_ra>
// kernel: tpu_custom_call.1
= control target key start
LH: loop header
LB: loop body
LE: loop exit
PB: predicated region body
PF: predicated region fallthrough
CT: control target
= control target key end

     0   :  { %s398_s0 = inlined_call_operand.vmem [shape: f32[8,256], index: 0, kind: input, shape index: {}]   ;;  %s399_s1 = inlined_call_operand.vmem [shape: f32[256,32], index: 1, kind: input, shape index: {}]   ;;  %s400_s2 = inlined_call_operand.vmem [shape: f32[1,32], index: 2, kind: input, shape index: {}]   ;;  %s401_s3 = inlined_call_operand.vmem [shape: f32[32,32], index: 3, kind: input, shape index: {}]   ;;  %s402_s4 = inlined_call_operand.vmem [shape: f32[1,32], index: 4, kind: input, shape index: {}]   ;;  %s403_s5 = inlined_call_operand.vmem [shape: f32[32,128], index: 5, kind: input, shape index: {}]   ;;  %s404_s6 = inlined_call_operand.vmem [shape: f32[1,128], index: 6, kind: input, shape index: {}]   ;;  %s405_s7 = inlined_call_operand.hbm [shape: f32[8,128], index: 7, kind: output, shape index: {}]  }
   0x1   :  { %v44_v0 = vld [vmem:[%s399_s1 + $0x78] sm:$0xff]  ;;  %v43_v1 = vld [vmem:[%s399_s1 + $0x70] sm:$0xff]  ;;  %v42_v4 = vld [vmem:[%s399_s1 + $0x68] sm:$0xff] }
   0x2   :  { %v60_v2 = vld [vmem:[%s399_s1 + $0xf8] sm:$0xff]  ;;  %65 = vmatpush.msra.mxu0 %v44_v0  ;;  %v59_v3 = vld [vmem:[%s399_s1 + $0xf0] sm:$0xff]  ;;  %v58_v5 = vld [vmem:[%s399_s1 + $0xe8] sm:$0xff] }
   0x3   :  { %85 = vmatpush.msra.mxu1 %v60_v2  ;;  %v41_v6 = vld [vmem:[%s399_s1 + $0x60] sm:$0xff]  ;;  %v40_v8 = vld [vmem:[%s399_s1 + $0x58] sm:$0xff]  ;;  %v39_v10 = vld [vmem:[%s399_s1 + $0x50] sm:$0xff] }
   0x4   :  { %66 = vmatpush.msra.mxu0 %v43_v1  ;;  %v57_v7 = vld [vmem:[%s399_s1 + $0xe0] sm:$0xff]  ;;  %v56_v9 = vld [vmem:[%s399_s1 + $0xd8] sm:$0xff]  ;;  %v55_v11 = vld [vmem:[%s399_s1 + $0xd0] sm:$0xff] }
   0x5   :  { %86 = vmatpush.msra.mxu1 %v59_v3  ;;  %v38_v12 = vld [vmem:[%s399_s1 + $0x48] sm:$0xff]  ;;  %v37_v14 = vld [vmem:[%s399_s1 + $0x40] sm:$0xff] }
   0x6   :  { %67 = vmatpush.msra.mxu0 %v42_v4  ;;  %v54_v13 = vld [vmem:[%s399_s1 + $0xc8] sm:$0xff]  ;;  %v53_v15 = vld [vmem:[%s399_s1 + $0xc0] sm:$0xff] }
   0x7   :  { %87 = vmatpush.msra.mxu1 %v58_v5 }
   0x8   :  { %68 = vmatpush.msra.mxu0 %v41_v6 }
   0x9   :  { %88 = vmatpush.msra.mxu1 %v57_v7 }
   0xa   :  { %69 = vmatpush.msra.mxu0 %v40_v8 }
   0xb   :  { %89 = vmatpush.msra.mxu1 %v56_v9 }
   0xc   :  { %70 = vmatpush.msra.mxu0 %v39_v10 }
   0xd   :  { %90 = vmatpush.msra.mxu1 %v55_v11 }
   0xe   :  { %12 = vsyncpa [#allocation3], 0  ;;  %71 = vmatpush.msra.mxu0 %v38_v12  ;;  %v36_v16 = vld [vmem:[%s399_s1 + $0x38] sm:$0xff]  ;;  %v35_v18 = vld [vmem:[%s399_s1 + $0x30] sm:$0xff]  ;;  %vm114_vm0 = vcmask 261120   ;;  %s219_s18 = smov [#allocation2]  }
   0xf   :  { %91 = vmatpush.msra.mxu1 %v54_v13  ;;  %v52_v17 = vld [vmem:[%s399_s1 + $0xb8] sm:$0xff]  ;;  %v51_v19 = vld [vmem:[%s399_s1 + $0xb0] sm:$0xff]  ;;  %v34_v20 = vld [vmem:[%s399_s1 + $0x28] sm:$0xff]  ;;  %s176_s19 = sshll.u32 %s219_s18, 4  ;;  %s178_s22 = sshll.u32 %s405_s7, 4  ;;  %s177_s19 = int_to_ptr.vmem [resolvable:$true] %s176_s19  ;;  %s179_s22 = int_to_ptr.hbm [resolvable:$true] %s178_s22 }
  0x10   :  { %72 = vmatpush.msra.mxu0 %v37_v14  ;;  %v50_v21 = vld [vmem:[%s399_s1 + $0xa8] sm:$0xff]  ;;  %v33_v22 = vld [vmem:[%s399_s1 + $0x20] sm:$0xff]  ;;  %v32_v24 = vld [vmem:[%s399_s1 + $0x18] sm:$0xff] }
  0x11   :  { %92 = vmatpush.msra.mxu1 %v53_v15  ;;  %v49_v23 = vld [vmem:[%s399_s1 + $0xa0] sm:$0xff]  ;;  %v48_v25 = vld [vmem:[%s399_s1 + $0x98] sm:$0xff]  ;;  %v31_v26 = vld [vmem:[%s399_s1 + $0x10] sm:$0xff] }
  0x12   :  { %73 = vmatpush.msra.mxu0 %v36_v16  ;;  %v47_v27 = vld [vmem:[%s399_s1 + $0x90] sm:$0xff]  ;;  %v30_v28 = vld [vmem:[%s399_s1 + $0x8] sm:$0xff]  ;;  %v29_v30 = vld [vmem:[%s399_s1] sm:$0xff] }
  0x13   :  { %93 = vmatpush.msra.mxu1 %v52_v17  ;;  %v46_v29 = vld [vmem:[%s399_s1 + $0x88] sm:$0xff]  ;;  %v45_v31 = vld [vmem:[%s399_s1 + $0x80] sm:$0xff]  ;;  %v109_v34 = vld [vmem:[%s401_s3 + $0x18] sm:$0xff] }
  0x14   :  { %74 = vmatpush.msra.mxu0 %v35_v18  ;;  %v27_v32 = vld [vmem:[%s398_s0] sm:$0xff]  ;;  %v28_v33 = vld [vmem:[%s398_s0 + $0x8] sm:$0xff]  ;;  %130 = vmatpush.msra.mxu2 %v109_v34  ;;  %v108_v35 = vld [vmem:[%s401_s3 + $0x10] sm:$0xff] }
  0x15   :  { %94 = vmatpush.msra.mxu1 %v51_v19  ;;  %v107_v36 = vld [vmem:[%s401_s3 + $0x8] sm:$0xff]  ;;  %v106_v37 = vld [vmem:[%s401_s3] sm:$0xff]  ;;  %v142_v38 = vld [vmem:[%s403_s5 + $0x18] sm:$0xff] }
  0x16   :  { %75 = vmatpush.msra.mxu0 %v34_v20  ;;  %131 = vmatpush.msra.mxu2 %v108_v35  ;;  %v190_v39 = vld [vmem:[%s400_s2] ss:$0 sm:$0xff]  ;;  %v141_v45 = vld [vmem:[%s403_s5 + $0x10] sm:$0xff]  ;;  %v140_v46 = vld [vmem:[%s403_s5 + $0x8] sm:$0xff] }
  0x17   :  { %95 = vmatpush.msra.mxu1 %v50_v21  ;;  %162 = vmatpush.msra.mxu3 %v142_v38  ;;  %v139_v47 = vld [vmem:[%s403_s5] sm:$0xff] }
  0x18   :  { %76 = vmatpush.msra.mxu0 %v33_v22  ;;  %132 = vmatpush.msra.mxu2 %v107_v36  ;;  %v191_v48 = vld [vmem:[%s402_s4] ss:$0 sm:$0xff] }
  0x19   :  { %96 = vmatpush.msra.mxu1 %v49_v23  ;;  %163 = vmatpush.msra.mxu3 %v141_v45  ;;  %v192_v52 = vld [vmem:[%s404_s6] ss:$0 sm:$0xff] }
  0x1a   :  { %77 = vmatpush.msra.mxu0 %v32_v24  ;;  %133 = vmatpush.msra.mxu2 %v106_v37 }
  0x1b   :  { %97 = vmatpush.msra.mxu1 %v48_v25  ;;  %164 = vmatpush.msra.mxu3 %v140_v46 }
  0x1c   :  { %78 = vmatpush.msra.mxu0 %v31_v26 }
  0x1d   :  { %98 = vmatpush.msra.mxu1 %v47_v27  ;;  %165 = vmatpush.msra.mxu3 %v139_v47 }
  0x1e   :  { %79 = vmatpush.msra.mxu0 %v30_v28 }
  0x1f   :  { %99 = vmatpush.msra.mxu1 %v46_v29 }
  0x20   :  { %80 = vmatpush.msra.mxu0 %v29_v30 }
  0x21   :  { %100 = vmatpush.msra.mxu1 %v45_v31  ;;  %81 = vmatmul.f32.vlgmr.msra.gmra.mxu0 %v27_v32 }
  0x22   :  { %101 = vmatmul.f32.vlgmr.msra.gmra.mxu1 %v28_v33 }
  0x9e   :  { %v82_v40 = vpop.f32.mrf.mxu0 }
  0x9f   :  { %v102_v41 = vpop.f32.mrf.mxu1  ;;  %v83_v42 = vadd.f32 %v190_v39, %v82_v40 }
  0xa1   :  { %v103_v43 = vadd.f32 %v102_v41, %v83_v42 }
  0xa3   :  { %v105_v44 = vmax.f32 %v103_v43, 0.0 }
  0xa5   :  { %187 = vmatmul.msk.f32.vlgmr.msra.gmra.mxu2 %vm114_vm0, %v105_v44 }
 0x128   :  { %v135_v49 = vpop.f32.mrf.mxu2 }
 0x129   :  { %v136_v50 = vadd.f32 %v191_v48, %v135_v49 }
 0x12b   :  { %v138_v51 = vmax.f32 %v136_v50, 0.0 }
 0x12d   :  { %188 = vmatmul.msk.f32.vlgmr.msra.gmra.mxu3 %vm114_vm0, %v138_v51 }
 0x1b0   :  { %v167_v53 = vpop.f32.mrf.mxu3 }
 0x1b1   :  { %v168_v54 = vadd.f32 %v192_v52, %v167_v53 }
 0x1b3   :  { %170 = vst [vmem:[#allocation2] sm:$0xff] %v168_v54 }
 0x1b4   :  { %181 = dma.vmem_to_hbm [thread:$0]  %s177_s19, 128, %s179_s22, [#allocation3]  }
 0x1b5   :  { %217 = dma.done.wait [#allocation3], 128  }
 0x1b6   :  { %218 = vsyncadd [#allocation3], 4294967168 }
 0x1b7   :  { %186 = vsyncpa [#allocation3], 1 }

</bundles_post_ra>
